<compile_context>
chip_gen: v7x
topology: tpu7x:2x2x1
jax: 0.10.0
libtpu: 0.0.40
codegen_flags: <defaults>
</compile_context>

<pallas_src>
import functools

import jax
import jax.numpy as jnp
import numpy as np
from jax.experimental import pallas as pl
from jax.experimental.pallas import tpu as pltpu

_LANE = 128      # vreg lane width
_SUBLANE = 8     # f32 sublane height


def _round_up(x: int, m: int) -> int:
    return ((x + m - 1) // m) * m


def _sigmoid(x):
    # One EUP push (tanh) instead of exp + reciprocal.
    return 0.5 * jnp.tanh(0.5 * x) + 0.5


def _resident_spec(block_shape, index_map):
    """BlockSpec for blocks whose index_map is constant over the grid.

    Buffered(1) keeps a single VMEM copy (halves the dominant VMEM consumer,
    the fused weight).  Falls back gracefully if this jax version has no
    per-BlockSpec pipeline_mode.
    """
    try:
        return pl.BlockSpec(block_shape, index_map,
                            pipeline_mode=pl.Buffered(1))
    except (TypeError, AttributeError):
        return pl.BlockSpec(block_shape, index_map)


def _gate_math(xh, w, b, c_prev):
    """Shared LSTM gate math on one (batch-block, hidden-block) tile."""
    th = c_prev.shape[-1]
    # Single fused MXU contraction for all four gates of this hidden block.
    gates = jnp.dot(xh, w, preferred_element_type=jnp.float32) + b
    i_g = _sigmoid(gates[:, 0 * th:1 * th])      # lane-aligned slices
    f_g = _sigmoid(gates[:, 1 * th:2 * th])
    g_g = jnp.tanh(gates[:, 2 * th:3 * th])
    o_g = _sigmoid(gates[:, 3 * th:4 * th])
    c_next = f_g * c_prev + i_g * g_g
    h_next = o_g * jnp.tanh(c_next)
    return h_next, c_next


def _lstm_kernel_packed(xh_ref, c_prev_ref, w_ref, b_ref, flat_ref):
    """Single hidden block: emits the packed [h | c] (bm, 2*Hp) tile."""
    Hp = c_prev_ref.shape[1]
    h_next, c_next = _gate_math(xh_ref[...], w_ref[...], b_ref[...],
                                c_prev_ref[...])
    flat_ref[:, :Hp] = h_next.astype(flat_ref.dtype)   # lane-dense full vst
    flat_ref[:, Hp:] = c_next.astype(flat_ref.dtype)


def _lstm_kernel_htiled(xh_ref, c_prev_ref, w_ref, b_ref, h_ref, c_ref):
    """Hidden-tiled variant: each grid step handles a th-wide column slice."""
    h_next, c_next = _gate_math(xh_ref[...], w_ref[...], b_ref[...],
                                c_prev_ref[...])
    h_ref[...] = h_next.astype(h_ref.dtype)
    c_ref[...] = c_next.astype(c_ref.dtype)


@functools.partial(jax.jit, static_argnames=("Hp", "th"))
def _lstm_cell_forward(xh_p, c_prev_p, w_blocks, b_blocks, *, Hp, th):
    Bp, IHp = xh_p.shape
    nhb = Hp // th
    H4t = 4 * th
    f32 = 4

    # Batch tile: biggest 128-multiple that still yields >= 2 grid blocks so
    # the "parallel" batch axis can be split across v7x's two TensorCores.
    bm = Bp
    for cand in (512, 256, 128):
        if Bp % cand == 0 and Bp // cand >= 2:
            bm = cand
            break

    w_blk = IHp * H4t * w_blocks.dtype.itemsize
    b_blk = H4t * b_blocks.dtype.itemsize
    xh_blk = bm * IHp * xh_p.dtype.itemsize

    cost = pl.CostEstimate(
        flops=2 * Bp * IHp * 4 * Hp,
        transcendentals=5 * Bp * Hp,                 # 3 sigmoids + 2 tanh
        bytes_accessed=(xh_p.size * xh_p.dtype.itemsize
                        + c_prev_p.size * f32
                        + w_blocks.size * w_blocks.dtype.itemsize
                        + b_blocks.size * b_blocks.dtype.itemsize
                        + Bp * 2 * Hp * f32))

    if nhb == 1:
        # Fast path: whole fused weight resident once; packed [h|c] output.
        grid = (Bp // bm,)
        in_specs = [
            pl.BlockSpec((bm, IHp), lambda i: (i, 0)),          # [x | h_prev]
            pl.BlockSpec((bm, Hp), lambda i: (i, 0)),           # c_prev
            _resident_spec((None, IHp, H4t), lambda i: (0, 0, 0)),  # weights
            _resident_spec((None, 1, H4t), lambda i: (0, 0, 0)),    # bias
        ]
        out_shape = jax.ShapeDtypeStruct((Bp, 2 * Hp), jnp.float32)
        out_specs = pl.BlockSpec((bm, 2 * Hp), lambda i: (i, 0))
        kernel = _lstm_kernel_packed
        dims = ("parallel",)
        est = (w_blk + b_blk                           # Buffered(1): one copy
               + 2 * (xh_blk + bm * Hp * f32)          # double-buffered inputs
               + 2 * (bm * 2 * Hp * f32)               # double-buffered output
               + (2 << 20))
    else:
        # Hidden-tiled path (large H): bounds the resident weight slab.
        grid = (Bp // bm, nhb)
        in_specs = [
            pl.BlockSpec((bm, IHp), lambda i, j: (i, 0)),
            pl.BlockSpec((bm, th), lambda i, j: (i, j)),
            pl.BlockSpec((None, IHp, H4t), lambda i, j: (j, 0, 0)),
            pl.BlockSpec((None, 1, H4t), lambda i, j: (j, 0, 0)),
        ]
        out_shape = (jax.ShapeDtypeStruct((Bp, Hp), jnp.float32),
                     jax.ShapeDtypeStruct((Bp, Hp), jnp.float32))
        out_specs = (pl.BlockSpec((bm, th), lambda i, j: (i, j)),
                     pl.BlockSpec((bm, th), lambda i, j: (i, j)))
        kernel = _lstm_kernel_htiled
        dims = ("parallel", "parallel")
        est = (2 * (w_blk + b_blk + xh_blk + bm * th * f32)
               + 2 * (2 * bm * th * f32)
               + (2 << 20))

    vmem_limit = int(min(max(est, 32 << 20), 64 << 20))

    return pl.pallas_call(
        kernel,
        out_shape=out_shape,
        grid=grid,
        in_specs=in_specs,
        out_specs=out_specs,
        compiler_params=pltpu.CompilerParams(
            dimension_semantics=dims,
            vmem_limit_bytes=vmem_limit),
        cost_estimate=cost,
    )(xh_p, c_prev_p, w_blocks, b_blocks)


class LSTMCellWrapperPallas:
    """JAX/Pallas equivalent of the PyTorch LSTMCellWrapper.

    Gate order along the fused 4H axis is nn.LSTMCell's [i, f, g, o].
    NOTE: weights are stored pre-transposed/fused ((I+H, 4H)); if importing
    torch nn.LSTMCell weights, use w_ih.T / w_hh.T and keep a parity test.
    """

    def __init__(self, input_size: int, hidden_size: int, key=None,
                 compute_dtype=jnp.float32,
                 max_weight_block_bytes: int = 12 * 1024 * 1024):
        self.input_size = int(input_size)
        self.hidden_size = int(hidden_size)
        self.memory_size = 2 * self.hidden_size
        self.compute_dtype = compute_dtype

        I, H = self.input_size, self.hidden_size
        IH, H4 = I + H, 4 * H

        if key is None:
            key = jax.random.PRNGKey(0)
        k1, k2, k3, k4 = jax.random.split(key, 4)
        bound = 1.0 / (H ** 0.5)          # nn.LSTMCell init: U(-1/sqrt(H), +)
        w_ih_t = jax.random.uniform(k1, (I, H4), jnp.float32, -bound, bound)
        w_hh_t = jax.random.uniform(k2, (H, H4), jnp.float32, -bound, bound)
        b_ih = jax.random.uniform(k3, (H4,), jnp.float32, -bound, bound)
        b_hh = jax.random.uniform(k4, (H4,), jnp.float32, -bound, bound)

        # Canonical (unpadded, f32) fused params — used by the JAX reference.
        self.w_cat_f32 = jnp.concatenate([w_ih_t, w_hh_t], axis=0)  # (IH, 4H)
        self.bias_f32 = b_ih + b_hh                                  # (4H,)

        # ---- Kernel-side layout: pad to lane boundaries, pre-block --------
        self.Hp = _round_up(H, _LANE)
        self.IHp = _round_up(IH, _LANE)
        itemsize = np.dtype(compute_dtype).itemsize

        # Hidden tile th: largest 128-multiple divisor of Hp whose weight
        # block (IHp x 4*th) fits the per-buffer budget (v7x 64 MiB VMEM).
        th = self.Hp
        while (self.IHp * 4 * th * itemsize > max_weight_block_bytes
               and th % 256 == 0):
            th //= 2
        self.th = th
        self.nhb = self.Hp // th

        # Pad each gate group H -> Hp and rows IH -> IHp, then arrange so
        # block j holds [Wi_j | Wf_j | Wg_j | Wo_j] (lane-aligned in-kernel).
        w4 = self.w_cat_f32.reshape(IH, 4, H)
        w4 = jnp.pad(w4, ((0, self.IHp - IH), (0, 0), (0, self.Hp - H)))
        self.w_blocks = (
            w4.reshape(self.IHp, 4, self.nhb, th)
              .transpose(2, 0, 1, 3)
              .reshape(self.nhb, self.IHp, 4 * th)
              .astype(compute_dtype))

        b4 = jnp.pad(self.bias_f32.reshape(4, H), ((0, 0), (0, self.Hp - H)))
        self.b_blocks = (
            b4.reshape(4, self.nhb, th)
              .transpose(1, 0, 2)
              .reshape(self.nhb, 1, 4 * th)
              .astype(jnp.float32))           # bias stays f32 (post-MXU add)

    def __call__(self, x_t, flat_state=None):
        B = x_t.shape[0]
        I, H, Hp = self.input_size, self.hidden_size, self.Hp

        x_t = x_t.astype(jnp.float32)
        if flat_state is None or flat_state.size == 0:
            h_prev = jnp.zeros((B, H), jnp.float32)
            c_prev = jnp.zeros((B, H), jnp.float32)
        else:
            flat_state = flat_state.astype(jnp.float32)
            h_prev = flat_state[:, :H]
            c_prev = flat_state[:, H:]

        Bp = _round_up(B, _SUBLANE)
        # Pack [x | h_prev] once (single fused MXU contraction in-kernel),
        # padding batch to a sublane multiple and (I+H) to a lane multiple.
        xh = jnp.concatenate([x_t, h_prev], axis=1)
        xh_p = jnp.pad(xh, ((0, Bp - B), (0, self.IHp - (I + H))))
        xh_p = xh_p.astype(self.compute_dtype)
        c_prev_p = jnp.pad(c_prev, ((0, Bp - B), (0, Hp - H)))

        out = _lstm_cell_forward(xh_p, c_prev_p, self.w_blocks, self.b_blocks,
                                 Hp=Hp, th=self.th)

        if self.nhb == 1:
            flat_p = out                        # (Bp, 2*Hp) packed [h | c]
            if Bp == B and Hp == H:
                h_next = flat_p[:, :H]
                flat_new = flat_p               # contract satisfied in-kernel
            else:
                h_next = flat_p[:B, :H]
                flat_new = jnp.concatenate(
                    [h_next, flat_p[:B, Hp:Hp + H]], axis=1)
        else:
            h_p, c_p = out
            h_next = h_p[:B, :H]
            flat_new = jnp.concatenate([h_next, c_p[:B, :H]], axis=1)

        # Mirror torch's .detach() on the recurrent memory.
        return h_next, jax.lax.stop_gradient(flat_new)


def _reference_lstm_cell(x, flat_state, w_cat, bias, hidden_size):
    """Pure-JAX reference mirroring nn.LSTMCell semantics (f32)."""
    H = hidden_size
    h_prev = flat_state[:, :H]
    c_prev = flat_state[:, H:]
    gates = jnp.concatenate([x, h_prev], axis=1) @ w_cat + bias
    i_g = jax.nn.sigmoid(gates[:, 0 * H:1 * H])
    f_g = jax.nn.sigmoid(gates[:, 1 * H:2 * H])
    g_g = jnp.tanh(gates[:, 2 * H:3 * H])
    o_g = jax.nn.sigmoid(gates[:, 3 * H:4 * H])
    c_next = f_g * c_prev + i_g * g_g
    h_next = o_g * jnp.tanh(c_next)
    return h_next, jnp.concatenate([h_next, c_next], axis=1)


if __name__ == "__main__":
    key = jax.random.PRNGKey(0)
    k_param, k_x, k_s, k_rest = jax.random.split(key, 4)

    # ---- Case A: small module (H=32 -> lane-padded to 128), f32 ----------
    B, INPUT_SIZE, HIDDEN = 4, 16, 32
    mod = LSTMCellWrapperPallas(INPUT_SIZE, HIDDEN, key=k_param)
    x_t = jax.random.normal(k_x, (B, INPUT_SIZE), jnp.float32)
    flat_state = jax.random.normal(k_s, (B, 2 * HIDDEN), jnp.float32)

    y, flat_new = mod(x_t, flat_state)
    jax.block_until_ready((y, flat_new))
    y_ref, flat_ref = _reference_lstm_cell(x_t, flat_state, mod.w_cat_f32,
                                           mod.bias_f32, HIDDEN)
    assert y.shape == (B, HIDDEN) and flat_new.shape == (B, 2 * HIDDEN)
    assert jnp.allclose(y, y_ref, atol=1e-5, rtol=1e-5)
    assert jnp.allclose(flat_new, flat_ref, atol=1e-5, rtol=1e-5)

    # Zero-state path.
    y0, flat0 = mod(x_t, None)
    jax.block_until_ready((y0, flat0))
    y0_ref, flat0_ref = _reference_lstm_cell(
        x_t, jnp.zeros((B, 2 * HIDDEN), jnp.float32),
        mod.w_cat_f32, mod.bias_f32, HIDDEN)
    assert jnp.allclose(y0, y0_ref, atol=1e-5, rtol=1e-5)
    assert jnp.allclose(flat0, flat0_ref, atol=1e-5, rtol=1e-5)

    # Recurrent feed-back.
    y1, flat1 = mod(x_t, flat_new)
    jax.block_until_ready((y1, flat1))
    y1_ref, _ = _reference_lstm_cell(x_t, flat_ref, mod.w_cat_f32,
                                     mod.bias_f32, HIDDEN)
    assert jnp.allclose(y1, y1_ref, atol=1e-5, rtol=1e-5)

    # ---- Case B: hidden-tiled path (force tiny weight-block budget) ------
    kB_p, kB_x, kB_s = jax.random.split(k_rest, 3)
    B2, I2, H2 = 8, 128, 256
    mod2 = LSTMCellWrapperPallas(I2, H2, key=kB_p, max_weight_block_bytes=1)
    assert mod2.nhb > 1            # exercises the H-tiled kernel
    x2 = jax.random.normal(kB_x, (B2, I2), jnp.float32)
    st2 = jax.random.normal(kB_s, (B2, 2 * H2), jnp.float32)
    y2, flat2 = mod2(x2, st2)
    jax.block_until_ready((y2, flat2))
    y2_ref, flat2_ref = _reference_lstm_cell(x2, st2, mod2.w_cat_f32,
                                             mod2.bias_f32, H2)
    assert jnp.allclose(y2, y2_ref, atol=1e-5, rtol=1e-5)
    assert jnp.allclose(flat2, flat2_ref, atol=1e-5, rtol=1e-5)

    # ---- Case C: bf16 weight/activation streaming (v6e/v7x MXU path) -----
    mod3 = LSTMCellWrapperPallas(INPUT_SIZE, HIDDEN, key=k_param,
                                 compute_dtype=jnp.bfloat16)
    y3, flat3 = mod3(x_t, flat_state)
    jax.block_until_ready((y3, flat3))
    assert jnp.allclose(y3, y_ref, atol=8e-2, rtol=5e-2)
    assert jnp.allclose(flat3, flat_ref, atol=8e-2, rtol=5e-2)

    print("KERNEL_OK")
</pallas_src>

<mosaic_0001>
module attributes {stable_mosaic.version = 11 : i64} {
  func.func @_lstm_kernel_packed(%arg0: i32, %arg1: memref<8x128xf32, #tpu.memory_space<vmem>>, %arg2: memref<8x128xf32, #tpu.memory_space<vmem>>, %arg3: memref<1x128x512xf32, #tpu.memory_space<vmem>>, %arg4: memref<1x1x512xf32, #tpu.memory_space<vmem>>, %arg5: memref<8x256xf32, #tpu.memory_space<vmem>>) attributes {dimension_semantics = [#tpu.dimension_semantics<parallel>], iteration_bounds = array<i64: 1>, scalar_prefetch = 0 : i64, scratch_operands = 0 : i64, tpu.core_type = #tpu.core_type<tc>, window_params = [{transform_indices = @transform_0, window_bounds = array<i64: 8, 128>}, {transform_indices = @transform_1, window_bounds = array<i64: 8, 128>}, {pipeline_mode = #tpu.pipeline_mode<synchronous>, transform_indices = @transform_2, window_bounds = array<i64: 1, 128, 512>}, {pipeline_mode = #tpu.pipeline_mode<synchronous>, transform_indices = @transform_3, window_bounds = array<i64: 1, 1, 512>}, {transform_indices = @transform_4, window_bounds = array<i64: 8, 256>}]} {
    %c0 = arith.constant 0 : index
    %c0_0 = arith.constant 0 : index
    %0 = vector.load %arg1[%c0, %c0_0] : memref<8x128xf32, #tpu.memory_space<vmem>>, vector<8x128xf32>
    %c0_1 = arith.constant 0 : index
    %c0_2 = arith.constant 0 : index
    %c0_3 = arith.constant 0 : index
    %1 = vector.load %arg3[%c0_1, %c0_2, %c0_3] : memref<1x128x512xf32, #tpu.memory_space<vmem>>, vector<1x128x512xf32>
    %2 = vector.shape_cast %1 : vector<1x128x512xf32> to vector<128x512xf32>
    %c0_4 = arith.constant 0 : index
    %c0_5 = arith.constant 0 : index
    %c0_6 = arith.constant 0 : index
    %3 = vector.load %arg4[%c0_4, %c0_5, %c0_6] : memref<1x1x512xf32, #tpu.memory_space<vmem>>, vector<1x1x512xf32>
    %4 = vector.shape_cast %3 : vector<1x1x512xf32> to vector<1x512xf32>
    %c0_7 = arith.constant 0 : index
    %c0_8 = arith.constant 0 : index
    %5 = vector.load %arg2[%c0_7, %c0_8] : memref<8x128xf32, #tpu.memory_space<vmem>>, vector<8x128xf32>
    %cst = arith.constant dense<0.000000e+00> : vector<8x512xf32>
    %6 = tpu.matmul %0, %2, %cst {dimension_numbers = #tpu.dot_dimension_numbers<[1], [0], [0], [1], [0, 0, 1, 1], [], []>} : vector<8x128xf32>, vector<128x512xf32>, vector<8x512xf32> -> vector<8x512xf32>
    %7 = vector.broadcast %4 : vector<1x512xf32> to vector<8x512xf32>
    %8 = arith.addf %6, %7 : vector<8x512xf32>
    %9 = vector.extract_strided_slice %8 {offsets = [0, 0], sizes = [8, 128], strides = [1, 1]} : vector<8x512xf32> to vector<8x128xf32>
    %cst_9 = arith.constant 5.000000e-01 : f32
    %10 = vector.broadcast %cst_9 : f32 to vector<8x128xf32>
    %11 = arith.mulf %10, %9 : vector<8x128xf32>
    %12 = math.tanh %11 : vector<8x128xf32>
    %cst_10 = arith.constant 5.000000e-01 : f32
    %13 = vector.broadcast %cst_10 : f32 to vector<8x128xf32>
    %14 = arith.mulf %13, %12 : vector<8x128xf32>
    %cst_11 = arith.constant 5.000000e-01 : f32
    %15 = vector.broadcast %cst_11 : f32 to vector<8x128xf32>
    %16 = arith.addf %14, %15 : vector<8x128xf32>
    %17 = vector.extract_strided_slice %8 {offsets = [0, 128], sizes = [8, 128], strides = [1, 1]} : vector<8x512xf32> to vector<8x128xf32>
    %cst_12 = arith.constant 5.000000e-01 : f32
    %18 = vector.broadcast %cst_12 : f32 to vector<8x128xf32>
    %19 = arith.mulf %18, %17 : vector<8x128xf32>
    %20 = math.tanh %19 : vector<8x128xf32>
    %cst_13 = arith.constant 5.000000e-01 : f32
    %21 = vector.broadcast %cst_13 : f32 to vector<8x128xf32>
    %22 = arith.mulf %21, %20 : vector<8x128xf32>
    %cst_14 = arith.constant 5.000000e-01 : f32
    %23 = vector.broadcast %cst_14 : f32 to vector<8x128xf32>
    %24 = arith.addf %22, %23 : vector<8x128xf32>
    %25 = vector.extract_strided_slice %8 {offsets = [0, 256], sizes = [8, 128], strides = [1, 1]} : vector<8x512xf32> to vector<8x128xf32>
    %26 = math.tanh %25 : vector<8x128xf32>
    %27 = vector.extract_strided_slice %8 {offsets = [0, 384], sizes = [8, 128], strides = [1, 1]} : vector<8x512xf32> to vector<8x128xf32>
    %cst_15 = arith.constant 5.000000e-01 : f32
    %28 = vector.broadcast %cst_15 : f32 to vector<8x128xf32>
    %29 = arith.mulf %28, %27 : vector<8x128xf32>
    %30 = math.tanh %29 : vector<8x128xf32>
    %cst_16 = arith.constant 5.000000e-01 : f32
    %31 = vector.broadcast %cst_16 : f32 to vector<8x128xf32>
    %32 = arith.mulf %31, %30 : vector<8x128xf32>
    %cst_17 = arith.constant 5.000000e-01 : f32
    %33 = vector.broadcast %cst_17 : f32 to vector<8x128xf32>
    %34 = arith.addf %32, %33 : vector<8x128xf32>
    %35 = arith.mulf %24, %5 : vector<8x128xf32>
    %36 = arith.mulf %16, %26 : vector<8x128xf32>
    %37 = arith.addf %35, %36 : vector<8x128xf32>
    %38 = math.tanh %37 : vector<8x128xf32>
    %39 = arith.mulf %34, %38 : vector<8x128xf32>
    %c0_18 = arith.constant 0 : index
    %c0_19 = arith.constant 0 : index
    %40 = vector.load %arg5[%c0_18, %c0_19] : memref<8x256xf32, #tpu.memory_space<vmem>>, vector<8x128xf32>
    tpu.vector_store %arg5[%c0_18, %c0_19], %39 {strides = array<i32>} : memref<8x256xf32, #tpu.memory_space<vmem>>, vector<8x128xf32>,
    %c0_20 = arith.constant 0 : index
    %c128 = arith.constant 128 : index
    %41 = vector.load %arg5[%c0_20, %c128] : memref<8x256xf32, #tpu.memory_space<vmem>>, vector<8x128xf32>
    tpu.vector_store %arg5[%c0_20, %c128], %37 {strides = array<i32>} : memref<8x256xf32, #tpu.memory_space<vmem>>, vector<8x128xf32>,
    return
  }
  func.func @transform_0(%arg0: i32) -> (i32, i32) {
    %c0_i32 = arith.constant 0 : i32
    %c0_i32_0 = arith.constant 0 : i32
    return %arg0, %c0_i32 : i32, i32
  }
  func.func @transform_1(%arg0: i32) -> (i32, i32) {
    %c0_i32 = arith.constant 0 : i32
    %c0_i32_0 = arith.constant 0 : i32
    return %arg0, %c0_i32 : i32, i32
  }
  func.func @transform_2(%arg0: i32) -> (i32, i32, i32) {
    %c0_i32 = arith.constant 0 : i32
    %c0_i32_0 = arith.constant 0 : i32
    %c0_i32_1 = arith.constant 0 : i32
    %c0_i32_2 = arith.constant 0 : i32
    return %c0_i32, %c0_i32_0, %c0_i32_1 : i32, i32, i32
  }
  func.func @transform_3(%arg0: i32) -> (i32, i32, i32) {
    %c0_i32 = arith.constant 0 : i32
    %c0_i32_0 = arith.constant 0 : i32
    %c0_i32_1 = arith.constant 0 : i32
    %c0_i32_2 = arith.constant 0 : i32
    return %c0_i32, %c0_i32_0, %c0_i32_1 : i32, i32, i32
  }
  func.func @transform_4(%arg0: i32) -> (i32, i32) {
    %c0_i32 = arith.constant 0 : i32
    %c0_i32_0 = arith.constant 0 : i32
    return %arg0, %c0_i32 : i32, i32
  }
}

</mosaic_0001>

<bundles_post_ra>
// kernel: _lstm_cell_forward.1
= control target key start
LH: loop header
LB: loop body
LE: loop exit
PB: predicated region body
PF: predicated region fallthrough
CT: control target
= control target key end

     0   :  { %9 = vsyncpa [#allocation3], 0  ;;  %s579_s0 = inlined_call_operand.hbm [shape: f32[8,128], index: 0, kind: input, shape index: {}]   ;;  %s580_s1 = inlined_call_operand.hbm [shape: f32[8,128], index: 1, kind: input, shape index: {}]   ;;  %s581_s2 = inlined_call_operand.hbm [shape: f32[1,128,512], index: 2, kind: input, shape index: {}]   ;;  %s582_s3 = inlined_call_operand.vmem [shape: f32[1,1,512], index: 3, kind: input, shape index: {}]   ;;  %s583_s4 = inlined_call_operand.hbm [shape: f32[8,256], index: 4, kind: output, shape index: {}]  }
   0x1   :  { %10 = vsyncpa [#allocation6], 0 }
   0x2   :  { %11 = vsyncpa [#allocation4], 0  ;;  %s496_s15 = smov [#allocation5]   ;;  %s497_s17 = smov [#allocation2]  }
   0x3   :  { %s28_s16 = sshll.u32 %s496_s15, 4  ;;  %s18_s18 = sshll.u32 %s497_s17, 4  ;;  %s29_s16 = int_to_ptr.vmem [resolvable:$true] %s28_s16  ;;  %s19_s18 = int_to_ptr.vmem [resolvable:$true] %s18_s18 }
   0x4   :  { %s402_s21 = scalar_lea.hbm %s580_s1, 128 }
   0x5   :  { %p403_p0 = scmp.ne.s32.totalorder %s580_s1, %s402_s21  ;;  %p406_p1 = scmp.lt.u32.totalorder %s402_s21, %s580_s1 }
   0x7   :  { %p408_p2 = pnand %p406_p1, %p403_p0 }
   0x9   :  { %411 = shalt.err (!%p408_p2)
}
   0xa   :  { %s412_s26 = scalar_lea.vmem %s29_s16, 128  ;;  %p417_p4 = scmp.lt.s32.totalorder %s29_s16, %s29_s16 }
   0xb   :  { %p413_p3 = scmp.ne.s32.totalorder %s29_s16, %s412_s26  ;;  %p418_p5 = scmp.lt.s32.totalorder %s412_s26, %s412_s26 }
   0xd   :  { %p419_p6 = por %p418_p5, %p417_p4 }
   0xf   :  { %p420_p7 = pnand %p419_p6, %p413_p3 }
  0x11   :  { %423 = shalt.err (!%p420_p7)
}
  0x12   :  { %31 = dma.hbm_to_vmem [thread:$0]  %s580_s1, 128, %s29_s16, [#allocation6]  }
  0x13   :  { %s424_s5 = scalar_lea.hbm %s579_s0, 128 }
  0x14   :  { %p425_p8 = scmp.ne.s32.totalorder %s579_s0, %s424_s5  ;;  %p428_p9 = scmp.lt.u32.totalorder %s424_s5, %s579_s0 }
  0x16   :  { %p430_p10 = pnand %p428_p9, %p425_p8 }
  0x18   :  { %433 = shalt.err (!%p430_p10)
}
  0x19   :  { %s434_s10 = scalar_lea.vmem %s19_s18, 128  ;;  %p439_p12 = scmp.lt.s32.totalorder %s19_s18, %s19_s18 }
  0x1a   :  { %p435_p11 = scmp.ne.s32.totalorder %s19_s18, %s434_s10  ;;  %p440_p13 = scmp.lt.s32.totalorder %s434_s10, %s434_s10 }
  0x1c   :  { %p441_p0 = por %p440_p13, %p439_p12 }
  0x1e   :  { %p442_p1 = pnand %p441_p0, %p435_p11 }
  0x20   :  { %445 = shalt.err (!%p442_p1)
}
  0x21   :  { %21 = dma.hbm_to_vmem [thread:$0]  %s579_s0, 128, %s19_s18, [#allocation3]  }
  0x22   :  { %s498_s12 = smov [#allocation7]   ;;  %s446_s16 = scalar_lea.hbm %s581_s2, 8192 }
  0x23   :  { %s37_s13 = sshll.u32 %s498_s12, 4  ;;  %p447_p2 = scmp.ne.s32.totalorder %s581_s2, %s446_s16  ;;  %s38_s13 = int_to_ptr.vmem [resolvable:$true] %s37_s13 }
  0x24   :  { %p450_p3 = scmp.lt.u32.totalorder %s446_s16, %s581_s2 }
  0x26   :  { %p452_p4 = pnand %p450_p3, %p447_p2 }
  0x28   :  { %455 = shalt.err (!%p452_p4)
}
  0x29   :  { %s456_s22 = scalar_lea.vmem %s38_s13, 8192  ;;  %p461_p6 = scmp.lt.s32.totalorder %s38_s13, %s38_s13 }
  0x2a   :  { %p457_p5 = scmp.ne.s32.totalorder %s38_s13, %s456_s22  ;;  %p462_p7 = scmp.lt.s32.totalorder %s456_s22, %s456_s22 }
  0x2c   :  { %p463_p8 = por %p462_p7, %p461_p6 }
  0x2e   :  { %p464_p9 = pnand %p463_p8, %p457_p5 }
  0x30   :  { %467 = shalt.err (!%p464_p9)
}
  0x31   :  { %s499_s0 = smov 512   ;;  %s500_s18 = smov 32  }
  0x32   :  { %43 = dma.hbm_to_vmem [thread:$0]  %s581_s2, 8192, %s38_s13, [#allocation6], %s499_s0, %s499_s0, %s500_s18  }
  0x33   :  { %490 = dma.done.wait [#allocation3], 128  }
  0x34   :  { %491 = vsyncadd [#allocation3], 4294967168 }
  0x35   :  { %492 = dma.done.wait [#allocation6], 8320  }
  0x36   :  { %493 = vsyncadd [#allocation6], 4294958976  ;;  %v501_v0 = vmov 0.0   ;;  %v57_v1 = vld [vmem:[#allocation7 + $0x8] sm:$0xff]  ;;  %v56_v3 = vld [vmem:[#allocation7] sm:$0xff] }
  0x37   :  { %207 = vmatprep.mubr.f32.mxu0 %v501_v0  ;;  %278 = vmatprep.mubr.f32.mxu1 %v501_v0  ;;  %v61_v2 = vld [vmem:[#allocation7 + $0x28] sm:$0xff]  ;;  %v60_v5 = vld [vmem:[#allocation7 + $0x20] sm:$0xff]  ;;  %v59_v12 = vld [vmem:[#allocation7 + $0x18] sm:$0xff] }
  0x38   :  { %v321_v4 = vpack.c.bf16 %v61_v2, %v57_v1  ;;  %v65_v6 = vld [vmem:[#allocation7 + $0x48] sm:$0xff]  ;;  %v323_v8 = vpack.c.bf16 %v60_v5, %v56_v3  ;;  %v64_v10 = vld [vmem:[#allocation7 + $0x40] sm:$0xff]  ;;  %v63_v13 = vld [vmem:[#allocation7 + $0x38] sm:$0xff] }
  0x39   :  { %v69_v7 = vld [vmem:[#allocation7 + $0x68] sm:$0xff]  ;;  %v68_v11 = vld [vmem:[#allocation7 + $0x60] sm:$0xff]  ;;  %v58_v14 = vld [vmem:[#allocation7 + $0x10] sm:$0xff]  ;;  %v353_v17 = vpack.c.bf16 %v63_v13, %v59_v12 }
  0x3a   :  { %v325_v9 = vpack.c.bf16 %v69_v7, %v65_v6  ;;  %322 = vmatprep.subr.bf16.mxu0 %v321_v4  ;;  %v62_v15 = vld [vmem:[#allocation7 + $0x30] sm:$0xff]  ;;  %v327_v16 = vpack.c.bf16 %v68_v11, %v64_v10  ;;  %v73_v19 = vld [vmem:[#allocation7 + $0x88] sm:$0xff]  ;;  %v72_v21 = vld [vmem:[#allocation7 + $0x80] sm:$0xff] }
  0x3b   :  { %324 = vmatpush1.bf16.msra.mxu0 %v323_v8  ;;  %v355_v18 = vpack.c.bf16 %v62_v15, %v58_v14  ;;  %v77_v20 = vld [vmem:[#allocation7 + $0xa8] sm:$0xff]  ;;  %v76_v23 = vld [vmem:[#allocation7 + $0xa0] sm:$0xff]  ;;  %v67_v24 = vld [vmem:[#allocation7 + $0x58] sm:$0xff]  ;;  %354 = vmatprep.subr.bf16.mxu1 %v353_v17 }
  0x3c   :  { %326 = vmatprep.subr.bf16.mxu0 %v325_v9  ;;  %v329_v22 = vpack.c.bf16 %v77_v20, %v73_v19  ;;  %v71_v25 = vld [vmem:[#allocation7 + $0x78] sm:$0xff]  ;;  %v66_v27 = vld [vmem:[#allocation7 + $0x50] sm:$0xff]  ;;  %v81_v29 = vld [vmem:[#allocation7 + $0xc8] sm:$0xff]  ;;  %v331_v32 = vpack.c.bf16 %v76_v23, %v72_v21 }
  0x3d   :  { %v357_v26 = vpack.c.bf16 %v71_v25, %v67_v24  ;;  %v70_v28 = vld [vmem:[#allocation7 + $0x70] sm:$0xff]  ;;  %356 = vmatpush1.bf16.msra.mxu1 %v355_v18  ;;  %v85_v31 = vld [vmem:[#allocation7 + $0xe8] sm:$0xff]  ;;  %v75_v33 = vld [vmem:[#allocation7 + $0x98] sm:$0xff] }
  0x3e   :  { %v359_v30 = vpack.c.bf16 %v70_v28, %v66_v27  ;;  %v79_v34 = vld [vmem:[#allocation7 + $0xb8] sm:$0xff]  ;;  %v74_v35 = vld [vmem:[#allocation7 + $0x90] sm:$0xff]  ;;  %v333_v36 = vpack.c.bf16 %v85_v31, %v81_v29  ;;  %v80_v37 = vld [vmem:[#allocation7 + $0xc0] sm:$0xff] }
  0x3f   :  { %328 = vmatpush1.bf16.msra.mxu0 %v327_v16  ;;  %358 = vmatprep.subr.bf16.mxu1 %v357_v26  ;;  %v84_v38 = vld [vmem:[#allocation7 + $0xe0] sm:$0xff]  ;;  %v361_v39 = vpack.c.bf16 %v79_v34, %v75_v33  ;;  %v78_v40 = vld [vmem:[#allocation7 + $0xb0] sm:$0xff]  ;;  %v89_v41 = vld [vmem:[#allocation7 + $0x108] sm:$0xff]  ;;  %v123_v34 = vlaneseq }
  0x40   :  { %330 = vmatprep.subr.bf16.mxu0 %v329_v22  ;;  %v93_v42 = vld [vmem:[#allocation7 + $0x128] sm:$0xff]  ;;  %v83_v43 = vld [vmem:[#allocation7 + $0xd8] sm:$0xff]  ;;  %v363_v44 = vpack.c.bf16 %v78_v40, %v74_v35  ;;  %v335_v46 = vpack.c.bf16 %v84_v38, %v80_v37  ;;  %v88_v47 = vld [vmem:[#allocation7 + $0x100] sm:$0xff] }
  0x41   :  { %360 = vmatpush1.bf16.msra.mxu1 %v359_v30  ;;  %v87_v45 = vld [vmem:[#allocation7 + $0xf8] sm:$0xff]  ;;  %v82_v49 = vld [vmem:[#allocation7 + $0xd0] sm:$0xff]  ;;  %v337_v51 = vpack.c.bf16 %v93_v42, %v89_v41  ;;  %v92_v52 = vld [vmem:[#allocation7 + $0x120] sm:$0xff]  ;;  %v124_v35 = vshrl.u32 %v123_v34, 7 }
  0x42   :  { %362 = vmatprep.subr.bf16.mxu1 %v361_v39  ;;  %v365_v48 = vpack.c.bf16 %v87_v45, %v83_v43  ;;  %v86_v50 = vld [vmem:[#allocation7 + $0xf0] sm:$0xff]  ;;  %v91_v53 = vld [vmem:[#allocation7 + $0x118] sm:$0xff]  ;;  %v97_v55 = vld [vmem:[#allocation7 + $0x148] sm:$0xff]  ;;  %v339_v58 = vpack.c.bf16 %v92_v52, %v88_v47 }
  0x43   :  { %332 = vmatpush1.bf16.msra.mxu0 %v331_v32  ;;  %v95_v54 = vld [vmem:[#allocation7 + $0x138] sm:$0xff]  ;;  %v101_v56 = vld [vmem:[#allocation7 + $0x168] sm:$0xff]  ;;  %v367_v57 = vpack.c.bf16 %v86_v50, %v82_v49  ;;  %v96_v59 = vld [vmem:[#allocation7 + $0x140] sm:$0xff]  ;;  %v129_v38 = vsub.s32 1, %v124_v35  ;;  %v133_v39 = vsub.s32 2, %v124_v35 }
  0x44   :  { %334 = vmatprep.subr.bf16.mxu0 %v333_v36  ;;  %v369_v60 = vpack.c.bf16 %v95_v54, %v91_v53  ;;  %v90_v61 = vld [vmem:[#allocation7 + $0x110] sm:$0xff]  ;;  %v341_v63 = vpack.c.bf16 %v101_v56, %v97_v55  ;;  %v100_v0 = vld [vmem:[#allocation7 + $0x160] sm:$0xff]  ;;  %v99_v1 = vld [vmem:[#allocation7 + $0x158] sm:$0xff]  ;;  %v125_v36 = vsub.s32 0, %v124_v35 }
  0x45   :  { %364 = vmatpush1.bf16.msra.mxu1 %v363_v44  ;;  %v94_v62 = vld [vmem:[#allocation7 + $0x130] sm:$0xff]  ;;  %v103_v2 = vld [vmem:[#allocation7 + $0x178] sm:$0xff]  ;;  %v105_v3 = vld [vmem:[#allocation7 + $0x188] sm:$0xff]  ;;  %v343_v6 = vpack.c.bf16 %v100_v0, %v96_v59 }
  0x46   :  { %366 = vmatprep.subr.bf16.mxu1 %v365_v48  ;;  %v109_v4 = vld [vmem:[#allocation7 + $0x1a8] sm:$0xff]  ;;  %v371_v5 = vpack.c.bf16 %v94_v62, %v90_v61  ;;  %v104_v7 = vld [vmem:[#allocation7 + $0x180] sm:$0xff]  ;;  %v373_v8 = vpack.c.bf16 %v103_v2, %v99_v1  ;;  %v98_v9 = vld [vmem:[#allocation7 + $0x150] sm:$0xff] }
  0x47   :  { %336 = vmatpush1.bf16.msra.mxu0 %v335_v46  ;;  %v102_v10 = vld [vmem:[#allocation7 + $0x170] sm:$0xff]  ;;  %v345_v11 = vpack.c.bf16 %v109_v4, %v105_v3  ;;  %v108_v12 = vld [vmem:[#allocation7 + $0x1a0] sm:$0xff]  ;;  %v107_v13 = vld [vmem:[#allocation7 + $0x198] sm:$0xff]  ;;  %v137_v46 = vsub.s32 3, %v124_v35 }
  0x48   :  { %338 = vmatprep.subr.bf16.mxu0 %v337_v51  ;;  %v111_v14 = vld [vmem:[#allocation7 + $0x1b8] sm:$0xff]  ;;  %v113_v15 = vld [vmem:[#allocation7 + $0x1c8] sm:$0xff]  ;;  %v375_v17 = vpack.c.bf16 %v102_v10, %v98_v9  ;;  %v347_v18 = vpack.c.bf16 %v108_v12, %v104_v7  ;;  %v112_v19 = vld [vmem:[#allocation7 + $0x1c0] sm:$0xff] }
  0x49   :  { %368 = vmatpush1.bf16.msra.mxu1 %v367_v57  ;;  %v117_v16 = vld [vmem:[#allocation7 + $0x1e8] sm:$0xff]  ;;  %v377_v20 = vpack.c.bf16 %v111_v14, %v107_v13  ;;  %v106_v21 = vld [vmem:[#allocation7 + $0x190] sm:$0xff]  ;;  %v116_v24 = vld [vmem:[#allocation7 + $0x1e0] sm:$0xff] }
  0x4a   :  { %370 = vmatprep.subr.bf16.mxu1 %v369_v60  ;;  %v110_v22 = vld [vmem:[#allocation7 + $0x1b0] sm:$0xff]  ;;  %v349_v23 = vpack.c.bf16 %v117_v16, %v113_v15  ;;  %v115_v25 = vld [vmem:[#allocation7 + $0x1d8] sm:$0xff]  ;;  %v351_v28 = vpack.c.bf16 %v116_v24, %v112_v19 }
  0x4b   :  { %340 = vmatpush1.bf16.msra.mxu0 %v339_v58  ;;  %v119_v26 = vld [vmem:[#allocation7 + $0x1f8] sm:$0xff]  ;;  %v379_v27 = vpack.c.bf16 %v110_v22, %v106_v21  ;;  %v114_v30 = vld [vmem:[#allocation7 + $0x1d0] sm:$0xff] }
  0x4c   :  { %342 = vmatprep.subr.bf16.mxu0 %v341_v63  ;;  %v381_v29 = vpack.c.bf16 %v119_v26, %v115_v25  ;;  %v118_v31 = vld [vmem:[#allocation7 + $0x1f0] sm:$0xff]  ;;  %v121_v62 = vld [vmem:[#allocation5] sm:$0xff] }
  0x4d   :  { %372 = vmatpush1.bf16.msra.mxu1 %v371_v5  ;;  %v383_v32 = vpack.c.bf16 %v118_v31, %v114_v30  ;;  %v55_v33 = vld [vmem:[#allocation2] sm:$0xff] }
  0x4e   :  { %374 = vmatprep.subr.bf16.mxu1 %v373_v8  ;;  %v120_v37 = vld [vmem:[%s582_s3] sm:$0xf]  ;;  %s502_s3 = smov [#allocation8]  }
  0x4f   :  { %344 = vmatpush1.bf16.msra.mxu0 %v343_v6  ;;  %v126_v40 = vrot.slane %v120_v37, %v125_v36  ;;  %v130_v41 = vrot.slane %v120_v37, %v129_v38  ;;  %v134_v43 = vrot.slane %v120_v37, %v133_v39  ;;  %v138_v53 = vrot.slane %v120_v37, %v137_v46  ;;  %s311_s26 = sshll.u32 %s502_s3, 4  ;;  %s312_s26 = int_to_ptr.vmem [resolvable:$true] %s311_s26 }
  0x50   :  { %346 = vmatprep.subr.bf16.mxu0 %v345_v11  ;;  %s468_s27 = scalar_lea.vmem %s312_s26, 256  ;;  %p473_p11 = scmp.lt.s32.totalorder %s312_s26, %s312_s26 }
  0x51   :  { %376 = vmatpush1.bf16.msra.mxu1 %v375_v17  ;;  %p469_p10 = scmp.ne.s32.totalorder %s312_s26, %s468_s27  ;;  %p474_p12 = scmp.lt.s32.totalorder %s468_s27, %s468_s27 }
  0x52   :  { %378 = vmatprep.subr.bf16.mxu1 %v377_v20 }
  0x53   :  { %348 = vmatpush1.bf16.msra.mxu0 %v347_v18  ;;  %p475_p13 = por %p474_p12, %p473_p11 }
  0x54   :  { %350 = vmatprep.subr.bf16.mxu0 %v349_v23 }
  0x55   :  { %380 = vmatpush1.bf16.msra.mxu1 %v379_v27  ;;  %p476_p0 = pnand %p475_p13, %p469_p10 }
  0x56   :  { %382 = vmatprep.subr.bf16.mxu1 %v381_v29 }
  0x57   :  { %352 = vmatpush1.bf16.msra.mxu0 %v351_v28 }
  0x59   :  { %384 = vmatpush1.bf16.msra.mxu1 %v383_v32 }
  0x5a   :  { %208 = vmatmul.mubr.f32.vlgmr.msra.gmra.mrb[0].mxu0 %v55_v33 }
  0x5c   :  { %279 = vmatmul.mubr.f32.vlgmr.msra.gmra.mrb[0].mxu1 %v55_v33 }
 0x12d   :  { %v209_v42 = vpop.f32.mrb[0].mxu0 }
 0x12e   :  { %v210_v44 = vadd.f32 %v209_v42, %v126_v40  ;;  %v211_v45 = vpop.f32.mrb[1].mxu0 }
 0x12f   :  { %v212_v47 = vadd.f32 %v211_v45, %v130_v41  ;;  %v280_v49 = vpop.f32.mrb[0].mxu1 }
 0x130   :  { %v285_v48 = vmul.f32 0.5, %v210_v44  ;;  %v281_v51 = vadd.f32 %v280_v49, %v134_v43  ;;  %v282_v52 = vpop.f32.mrb[1].mxu1 }
 0x131   :  { %v289_v50 = vmul.f32 0.5, %v212_v47  ;;  %v283_v54 = vadd.f32 %v282_v52, %v138_v53 }
 0x132   :  { %392 = vtanh.f32 %v285_v48 }
 0x133   :  { %394 = vtanh.f32 %v289_v50  ;;  %v294_v55 = vmul.f32 0.5, %v283_v54 }
 0x134   :  { %396 = vtanh.f32 %v281_v51 }
 0x135   :  { %398 = vtanh.f32 %v294_v55 }
 0x13c   :  { %v393_v56 = vpop.eup %392 }
 0x13d   :  { %v395_v57 = vpop.eup %394  ;;  %v287_v58 = vmul.f32 0.5, %v393_v56 }
 0x13e   :  { %v397_v59 = vpop.eup %396  ;;  %v291_v60 = vmul.f32 0.5, %v395_v57 }
 0x13f   :  { %v288_v61 = vadd.f32 0.5, %v287_v58  ;;  %v399_v3 = vpop.eup %398 }
 0x140   :  { %v292_v63 = vadd.f32 0.5, %v291_v60  ;;  %v296_v4 = vmul.f32 0.5, %v399_v3 }
 0x141   :  { %v299_v0 = vmul.f32 %v397_v59, %v288_v61 }
 0x142   :  { %v298_v1 = vmul.f32 %v292_v63, %v121_v62  ;;  %v297_v5 = vadd.f32 0.5, %v296_v4 }
 0x144   :  { %v300_v2 = vadd.f32 %v299_v0, %v298_v1 }
 0x146   :  { %400 = vtanh.f32 %v300_v2  ;;  %304 = vst [vmem:[#allocation8 + $0x8] sm:$0xff] %v300_v2 }
 0x150   :  { %v401_v6 = vpop.eup %400 }
 0x151   :  { %v302_v7 = vmul.f32 %v401_v6, %v297_v5 }
 0x153   :  { %303 = vst [vmem:[#allocation8] sm:$0xff] %v302_v7 }
 0x154   :  { %479 = shalt.err (!%p476_p0)
}
 0x155   :  { %s480_s30 = scalar_lea.hbm %s583_s4, 256 }
 0x156   :  { %p481_p1 = scmp.ne.s32.totalorder %s583_s4, %s480_s30  ;;  %p484_p2 = scmp.lt.u32.totalorder %s480_s30, %s583_s4 }
 0x158   :  { %p486_p3 = pnand %p484_p2, %p481_p1 }
 0x15a   :  { %489 = shalt.err (!%p486_p3)
}
 0x15b   :  { %314 = dma.vmem_to_hbm [thread:$0]  %s312_s26, 256, %s583_s4, [#allocation4]  }
 0x15c   :  { %494 = dma.done.wait [#allocation4], 256  }
 0x15d   :  { %495 = vsyncadd [#allocation4], 4294967040 }
 0x15e   :  { %318 = vsyncpa [#allocation3], 1 }
 0x15f   :  { %319 = vsyncpa [#allocation6], 1 }
 0x160   :  { %320 = vsyncpa [#allocation4], 1 }

</bundles_post_ra>
